<compile_context>
chip_gen: v7x
topology: tpu7x:2x2x1
jax: 0.10.0
libtpu: 0.0.40
codegen_flags: <defaults>
</compile_context>

<pallas_src>
import functools

import jax
import jax.numpy as jnp
from jax import lax
from jax.experimental import pallas as pl
from jax.experimental.pallas import tpu as pltpu

EPSILON = 1e-4  # PPNet.epsilon


def _ppnet_kernel(f_ref, w1_ref, b1_ref, w2_ref, b2_ref, proto_ref, p2_ref,
                  lastw_ref, logits_ref, dist_ref):
    # f_ref: (C, T) channel-major bf16 tile of backbone features (one column per patch).
    f = f_ref[...]                                            # bf16

    # --- add_on_layers: Conv1x1 -> ReLU -> Conv1x1 -> Sigmoid (per-patch linear) ---
    # Weights kept in PyTorch (out, in) orientation; channel-major means W @ x.
    # bf16 operands, f32 accumulation.
    h = jnp.dot(w1_ref[...], f, preferred_element_type=jnp.float32) + b1_ref[...]
    h = jnp.maximum(h, 0.0).astype(jnp.bfloat16)
    z = jnp.dot(w2_ref[...], h, preferred_element_type=jnp.float32) + b2_ref[...]
    # sigmoid via tanh: exact and lives in the (otherwise idle) EUP slot.
    y = 0.5 * jnp.tanh(0.5 * z) + 0.5                         # (C, T) f32

    # --- _l2_convolution with 1x1 prototypes: ||y - p||^2 per (prototype, patch) ---
    # proto_ref holds (-2 * prototype_vectors) in bf16; p2_ref holds sum(p^2) per proto.
    y_b = y.astype(jnp.bfloat16)
    y32 = y_b.astype(jnp.float32)                             # use the same rounded y
    y2 = jnp.sum(y32 * y32, axis=0, keepdims=True)            # (1, T)  sublane reduce
    xp2 = jnp.dot(proto_ref[...], y_b,
                  preferred_element_type=jnp.float32)         # (P, T) == -2 * <p, y>
    d = jnp.maximum(y2 + xp2 + p2_ref[...], 0.0)              # relu(y2 - 2xp + p2)
    dist_ref[...] = d

    # --- distance_2_similarity ('log') + last_layer (Linear, no bias) ---
    # log((d+1)/(d+eps)) == log1p((1-eps)/(d+eps)); recip goes to the EUP approx path.
    sim = jnp.log1p((1.0 - EPSILON) * pl.reciprocal(d + EPSILON, approx=True))
    logits_ref[...] = jnp.dot(lastw_ref[...], sim.astype(jnp.bfloat16),
                              preferred_element_type=jnp.float32)   # (Kp, T)


def ppnet_forward(x, params, *, tile_hw=8192):
    """PPNet.forward with patch_classification=True. Returns (logits, distances).

    x: (B, Cin, H, W) float32 (NCHW, like PyTorch).
    logits: (B, H, W, num_classes); distances: (B, P, H, W) float32.
    """
    B, _, H, W = x.shape

    # TODO(synk): `unet_features` backbone is external / not defined in the
    # reference module; stand in with a single 3x3 SAME conv producing
    # prototype-dim channels (the add-on + prototype hot path is in Pallas).
    feat = lax.conv_general_dilated(
        x, params["backbone_w"], window_strides=(1, 1), padding="SAME",
        dimension_numbers=("NCHW", "OIHW", "NCHW"))
    C = feat.shape[1]
    HW = H * W

    # Channel-major: (B, C, H*W) -- a free reshape from NCHW, patch index on lanes.
    # Ship features to the kernel in bf16 (halves the largest input HBM stream).
    f = feat.reshape(B, C, HW).astype(jnp.bfloat16)

    # Spatial tile: multiple of 128 (lane width), clamped to the image.
    HW128 = pl.cdiv(HW, 128) * 128
    t = max(128, min(pl.cdiv(int(tile_hw), 128) * 128, HW128))
    if B == 1 and HW128 >= 256:
        # keep >= 2 spatial steps so both v7x TensorCores get work at batch 1
        t = min(t, max(128, pl.cdiv(HW128 // 2, 128) * 128))
    HWp = pl.cdiv(HW, t) * t
    if HWp != HW:
        f = jnp.pad(f, ((0, 0), (0, 0), (0, HWp - HW)))

    P = params["proto"].shape[0]
    K = params["last_w"].shape[0]
    Kp = pl.cdiv(K, 8) * 8  # full sublane group for the logits rows

    # Constant folding / casting done once in the wrapper (not per grid step).
    w1_b = params["w1"].astype(jnp.bfloat16)
    w2_b = params["w2"].astype(jnp.bfloat16)
    proto_neg2 = (-2.0 * params["proto"]).astype(jnp.bfloat16)          # (P, C)
    p2 = jnp.sum(params["proto"] * params["proto"], axis=1,
                 keepdims=True).astype(jnp.float32)                      # (P, 1)
    last_w = params["last_w"]
    if Kp != K:
        last_w = jnp.pad(last_w, ((0, Kp - K), (0, 0)))
    last_w_b = last_w.astype(jnp.bfloat16)                               # (Kp, P)

    def const_spec(shape):
        return pl.BlockSpec(shape, lambda b, m: (0,) * len(shape))

    cost = pl.CostEstimate(
        flops=int(2 * (2 * C * C + P * C + Kp * P) * HW * B),
        transcendentals=int((C + 2 * P) * HW * B),
        bytes_accessed=int(B * HW * (C * 2 + (Kp + P) * 4)
                           + (2 * C * C + P * C + Kp * P) * 2 + (2 * C + P) * 4),
    )

    logits_t, dist_t = pl.pallas_call(
        _ppnet_kernel,
        out_shape=(jax.ShapeDtypeStruct((B, Kp, HWp), jnp.float32),
                   jax.ShapeDtypeStruct((B, P, HWp), jnp.float32)),
        grid=(B, HWp // t),
        in_specs=[
            pl.BlockSpec((None, C, t), lambda b, m: (b, 0, m)),  # features tile (bf16)
            const_spec((C, C)),   # w1  (out, in) bf16
            const_spec((C, 1)),   # b1  f32
            const_spec((C, C)),   # w2  (out, in) bf16
            const_spec((C, 1)),   # b2  f32
            const_spec((P, C)),   # -2 * prototype vectors (P, C) bf16
            const_spec((P, 1)),   # sum(proto^2) per prototype f32
            const_spec((Kp, P)),  # last layer weight, zero-padded rows, bf16
        ],
        out_specs=[
            pl.BlockSpec((None, Kp, t), lambda b, m: (b, 0, m)),  # logits (Kp, T)
            pl.BlockSpec((None, P, t), lambda b, m: (b, 0, m)),   # distances (P, T)
        ],
        compiler_params=pltpu.CompilerParams(
            dimension_semantics=("parallel", "parallel"),
            vmem_limit_bytes=48 * 1024 * 1024),
        cost_estimate=cost,
    )(f, w1_b, params["b1"], w2_b, params["b2"], proto_neg2, p2, last_w_b)

    distances = dist_t[:, :, :HW].reshape(B, P, H, W)
    logits = jnp.transpose(logits_t[:, :K, :HW], (0, 2, 1)).reshape(B, H, W, K)
    return logits, distances


def init_params(key, cin, c_proto, num_prototypes, num_classes):
    assert num_prototypes % num_classes == 0
    ks = jax.random.split(key, 4)

    # backbone stand-in: 3x3 conv Cin -> c_proto (OIHW)
    backbone_w = jax.random.normal(ks[0], (c_proto, cin, 3, 3), jnp.float32) * \
        (2.0 / (cin * 9)) ** 0.5

    # add-on 1x1 convs: kaiming_normal(mode='fan_out'), bias = 0; (out, in) layout.
    std = (2.0 / c_proto) ** 0.5
    w1 = jax.random.normal(ks[1], (c_proto, c_proto), jnp.float32) * std
    w2 = jax.random.normal(ks[2], (c_proto, c_proto), jnp.float32) * std

    # prototype_vectors = torch.rand(P, C, 1, 1) -> uniform [0, 1)
    proto = jax.random.uniform(ks[3], (num_prototypes, c_proto), jnp.float32)

    # last layer initialized via set_last_layer_incorrect_connection(-0.5)
    npc = num_prototypes // num_classes
    ident = jnp.zeros((num_prototypes, num_classes), jnp.float32)
    for i in range(num_classes):
        ident = ident.at[i * npc:(i + 1) * npc, i].set(1.0)
    last_w = 1.0 * ident.T + (-0.5) * (1.0 - ident.T)   # (K, P)

    return dict(
        backbone_w=backbone_w,
        w1=w1, b1=jnp.zeros((c_proto, 1), jnp.float32),
        w2=w2, b2=jnp.zeros((c_proto, 1), jnp.float32),
        proto=proto,
        last_w=last_w,
    )


def _reference_forward(x, params):
    """Pure-JAX f32 reference of the same forward (for a sanity check)."""
    feat = lax.conv_general_dilated(
        x, params["backbone_w"], (1, 1), "SAME",
        dimension_numbers=("NCHW", "OIHW", "NCHW"))
    B, C, H, W = feat.shape
    f = jnp.transpose(feat, (0, 2, 3, 1)).reshape(-1, C)
    h = jnp.maximum(f @ params["w1"].T + params["b1"][:, 0], 0.0)
    y = jax.nn.sigmoid(h @ params["w2"].T + params["b2"][:, 0])
    p = params["proto"]
    d = jnp.maximum(jnp.sum(y * y, -1, keepdims=True)
                    - 2.0 * (y @ p.T) + jnp.sum(p * p, -1)[None, :], 0.0)
    sim = jnp.log((d + 1.0) / (d + EPSILON))
    logits = sim @ params["last_w"].T
    K = params["last_w"].shape[0]
    P = p.shape[0]
    return (logits.reshape(B, H, W, K),
            d.reshape(B, H, W, P).transpose(0, 3, 1, 2))


if __name__ == "__main__":
    # Small synthetic config: image 16x16, 4 input vars, prototype_shape=(40,32,1,1),
    # num_classes=4 (-> 10 prototypes per class), patch_classification=True.
    B, CIN, H, W = 2, 4, 16, 16
    C_PROTO, NUM_PROTO, NUM_CLASSES = 32, 40, 4

    key = jax.random.PRNGKey(0)
    kx, kp = jax.random.split(key)
    x = jax.random.normal(kx, (B, CIN, H, W), jnp.float32)
    params = init_params(kp, CIN, C_PROTO, NUM_PROTO, NUM_CLASSES)

    fwd = jax.jit(functools.partial(ppnet_forward, tile_hw=8192))
    logits, distances = fwd(x, params)
    jax.block_until_ready((logits, distances))

    assert logits.shape == (B, H, W, NUM_CLASSES)
    assert distances.shape == (B, NUM_PROTO, H, W)

    # Tolerance accounts for bf16 MXU operands (f32 accumulation) and the
    # approx-reciprocal log-similarity; the f32 reference is exact.
    ref_logits, ref_dist = _reference_forward(x, params)
    assert jnp.all(jnp.isfinite(logits)) and jnp.all(jnp.isfinite(distances))
    assert jnp.allclose(logits, ref_logits, rtol=5e-2, atol=5e-2)
    assert jnp.allclose(distances, ref_dist, rtol=5e-2, atol=5e-2)

    print("KERNEL_OK")
</pallas_src>

<mosaic_0001>
module attributes {stable_mosaic.version = 11 : i64} {
  func.func @_ppnet_kernel(%arg0: i32, %arg1: i32, %arg2: memref<1x32x256xbf16, #tpu.memory_space<vmem>>, %arg3: memref<32x32xbf16, #tpu.memory_space<vmem>>, %arg4: memref<32x1xf32, #tpu.memory_space<vmem>>, %arg5: memref<32x32xbf16, #tpu.memory_space<vmem>>, %arg6: memref<32x1xf32, #tpu.memory_space<vmem>>, %arg7: memref<40x32xbf16, #tpu.memory_space<vmem>>, %arg8: memref<40x1xf32, #tpu.memory_space<vmem>>, %arg9: memref<8x40xbf16, #tpu.memory_space<vmem>>, %arg10: memref<1x8x256xf32, #tpu.memory_space<vmem>>, %arg11: memref<1x40x256xf32, #tpu.memory_space<vmem>>) attributes {dimension_semantics = [#tpu.dimension_semantics<parallel>, #tpu.dimension_semantics<parallel>], iteration_bounds = array<i64: 2, 1>, scalar_prefetch = 0 : i64, scratch_operands = 0 : i64, tpu.core_type = #tpu.core_type<tc>, window_params = [{transform_indices = @transform_0, window_bounds = array<i64: 1, 32, 256>}, {pipeline_mode = #tpu.pipeline_mode<synchronous>, transform_indices = @transform_1, window_bounds = array<i64: 32, 32>}, {pipeline_mode = #tpu.pipeline_mode<synchronous>, transform_indices = @transform_2, window_bounds = array<i64: 32, 1>}, {pipeline_mode = #tpu.pipeline_mode<synchronous>, transform_indices = @transform_3, window_bounds = array<i64: 32, 32>}, {pipeline_mode = #tpu.pipeline_mode<synchronous>, transform_indices = @transform_4, window_bounds = array<i64: 32, 1>}, {pipeline_mode = #tpu.pipeline_mode<synchronous>, transform_indices = @transform_5, window_bounds = array<i64: 40, 32>}, {pipeline_mode = #tpu.pipeline_mode<synchronous>, transform_indices = @transform_6, window_bounds = array<i64: 40, 1>}, {pipeline_mode = #tpu.pipeline_mode<synchronous>, transform_indices = @transform_7, window_bounds = array<i64: 8, 40>}, {transform_indices = @transform_8, window_bounds = array<i64: 1, 8, 256>}, {transform_indices = @transform_9, window_bounds = array<i64: 1, 40, 256>}]} {
    %c0 = arith.constant 0 : index
    %c0_0 = arith.constant 0 : index
    %c0_1 = arith.constant 0 : index
    %0 = vector.load %arg2[%c0, %c0_0, %c0_1] : memref<1x32x256xbf16, #tpu.memory_space<vmem>>, vector<1x32x256xbf16>
    %1 = vector.shape_cast %0 : vector<1x32x256xbf16> to vector<32x256xbf16>
    %c0_2 = arith.constant 0 : index
    %c0_3 = arith.constant 0 : index
    %2 = vector.load %arg3[%c0_2, %c0_3] : memref<32x32xbf16, #tpu.memory_space<vmem>>, vector<32x32xbf16>
    %cst = arith.constant dense<0.000000e+00> : vector<32x256xf32>
    %3 = tpu.matmul %2, %1, %cst {dimension_numbers = #tpu.dot_dimension_numbers<[1], [0], [0], [1], [0, 0, 1, 1], [], []>} : vector<32x32xbf16>, vector<32x256xbf16>, vector<32x256xf32> -> vector<32x256xf32>
    %c0_4 = arith.constant 0 : index
    %c0_5 = arith.constant 0 : index
    %4 = vector.load %arg4[%c0_4, %c0_5] : memref<32x1xf32, #tpu.memory_space<vmem>>, vector<32x1xf32>
    %5 = vector.broadcast %4 : vector<32x1xf32> to vector<32x256xf32>
    %6 = arith.addf %3, %5 : vector<32x256xf32>
    %cst_6 = arith.constant 0.000000e+00 : f32
    %7 = vector.broadcast %cst_6 : f32 to vector<32x256xf32>
    %8 = arith.maximumf %6, %7 : vector<32x256xf32>
    %9 = arith.truncf %8 : vector<32x256xf32> to vector<32x256xbf16>
    %c0_7 = arith.constant 0 : index
    %c0_8 = arith.constant 0 : index
    %10 = vector.load %arg5[%c0_7, %c0_8] : memref<32x32xbf16, #tpu.memory_space<vmem>>, vector<32x32xbf16>
    %cst_9 = arith.constant dense<0.000000e+00> : vector<32x256xf32>
    %11 = tpu.matmul %10, %9, %cst_9 {dimension_numbers = #tpu.dot_dimension_numbers<[1], [0], [0], [1], [0, 0, 1, 1], [], []>} : vector<32x32xbf16>, vector<32x256xbf16>, vector<32x256xf32> -> vector<32x256xf32>
    %c0_10 = arith.constant 0 : index
    %c0_11 = arith.constant 0 : index
    %12 = vector.load %arg6[%c0_10, %c0_11] : memref<32x1xf32, #tpu.memory_space<vmem>>, vector<32x1xf32>
    %13 = vector.broadcast %12 : vector<32x1xf32> to vector<32x256xf32>
    %14 = arith.addf %11, %13 : vector<32x256xf32>
    %cst_12 = arith.constant 5.000000e-01 : f32
    %15 = vector.broadcast %cst_12 : f32 to vector<32x256xf32>
    %16 = arith.mulf %15, %14 : vector<32x256xf32>
    %17 = math.tanh %16 : vector<32x256xf32>
    %cst_13 = arith.constant 5.000000e-01 : f32
    %18 = vector.broadcast %cst_13 : f32 to vector<32x256xf32>
    %19 = arith.mulf %18, %17 : vector<32x256xf32>
    %cst_14 = arith.constant 5.000000e-01 : f32
    %20 = vector.broadcast %cst_14 : f32 to vector<32x256xf32>
    %21 = arith.addf %19, %20 : vector<32x256xf32>
    %22 = arith.truncf %21 : vector<32x256xf32> to vector<32x256xbf16>
    %23 = arith.extf %22 : vector<32x256xbf16> to vector<32x256xf32>
    %24 = arith.mulf %23, %23 : vector<32x256xf32>
    %cst_15 = arith.constant dense<0.000000e+00> : vector<256xf32>
    %25 = vector.multi_reduction <add>, %24, %cst_15 [0] : vector<32x256xf32> to vector<256xf32>
    %26 = vector.shape_cast %25 : vector<256xf32> to vector<1x256xf32>
    %c0_16 = arith.constant 0 : index
    %c0_17 = arith.constant 0 : index
    %27 = vector.load %arg7[%c0_16, %c0_17] : memref<40x32xbf16, #tpu.memory_space<vmem>>, vector<40x32xbf16>
    %cst_18 = arith.constant dense<0.000000e+00> : vector<40x256xf32>
    %28 = tpu.matmul %27, %22, %cst_18 {dimension_numbers = #tpu.dot_dimension_numbers<[1], [0], [0], [1], [0, 0, 1, 1], [], []>} : vector<40x32xbf16>, vector<32x256xbf16>, vector<40x256xf32> -> vector<40x256xf32>
    %29 = vector.broadcast %26 : vector<1x256xf32> to vector<40x256xf32>
    %30 = arith.addf %29, %28 : vector<40x256xf32>
    %c0_19 = arith.constant 0 : index
    %c0_20 = arith.constant 0 : index
    %31 = vector.load %arg8[%c0_19, %c0_20] : memref<40x1xf32, #tpu.memory_space<vmem>>, vector<40x1xf32>
    %32 = vector.broadcast %31 : vector<40x1xf32> to vector<40x256xf32>
    %33 = arith.addf %30, %32 : vector<40x256xf32>
    %cst_21 = arith.constant 0.000000e+00 : f32
    %34 = vector.broadcast %cst_21 : f32 to vector<40x256xf32>
    %35 = arith.maximumf %33, %34 : vector<40x256xf32>
    %c0_22 = arith.constant 0 : index
    %c0_23 = arith.constant 0 : index
    %c0_24 = arith.constant 0 : index
    %36 = vector.load %arg11[%c0_22, %c0_23, %c0_24] : memref<1x40x256xf32, #tpu.memory_space<vmem>>, vector<1x40x256xf32>
    %37 = vector.shape_cast %36 : vector<1x40x256xf32> to vector<40x256xf32>
    %38 = vector.shape_cast %35 : vector<40x256xf32> to vector<1x40x256xf32>
    tpu.vector_store %arg11[%c0_22, %c0_23, %c0_24], %38 {strides = array<i32>} : memref<1x40x256xf32, #tpu.memory_space<vmem>>, vector<1x40x256xf32>,
    %cst_25 = arith.constant 9.99999974E-5 : f32
    %39 = vector.broadcast %cst_25 : f32 to vector<40x256xf32>
    %40 = arith.addf %35, %39 : vector<40x256xf32>
    %41 = tpu.reciprocal %40 {approx = true} : vector<40x256xf32> -> vector<40x256xf32>
    %cst_26 = arith.constant 0.999899983 : f32
    %42 = vector.broadcast %cst_26 : f32 to vector<40x256xf32>
    %43 = arith.mulf %42, %41 : vector<40x256xf32>
    %44 = math.log1p %43 : vector<40x256xf32>
    %c0_27 = arith.constant 0 : index
    %c0_28 = arith.constant 0 : index
    %45 = vector.load %arg9[%c0_27, %c0_28] : memref<8x40xbf16, #tpu.memory_space<vmem>>, vector<8x40xbf16>
    %46 = arith.truncf %44 : vector<40x256xf32> to vector<40x256xbf16>
    %cst_29 = arith.constant dense<0.000000e+00> : vector<8x256xf32>
    %47 = tpu.matmul %45, %46, %cst_29 {dimension_numbers = #tpu.dot_dimension_numbers<[1], [0], [0], [1], [0, 0, 1, 1], [], []>} : vector<8x40xbf16>, vector<40x256xbf16>, vector<8x256xf32> -> vector<8x256xf32>
    %c0_30 = arith.constant 0 : index
    %c0_31 = arith.constant 0 : index
    %c0_32 = arith.constant 0 : index
    %48 = vector.load %arg10[%c0_30, %c0_31, %c0_32] : memref<1x8x256xf32, #tpu.memory_space<vmem>>, vector<1x8x256xf32>
    %49 = vector.shape_cast %48 : vector<1x8x256xf32> to vector<8x256xf32>
    %50 = vector.shape_cast %47 : vector<8x256xf32> to vector<1x8x256xf32>
    tpu.vector_store %arg10[%c0_30, %c0_31, %c0_32], %50 {strides = array<i32>} : memref<1x8x256xf32, #tpu.memory_space<vmem>>, vector<1x8x256xf32>,
    return
  }
  func.func @transform_0(%arg0: i32, %arg1: i32) -> (i32, i32, i32) {
    %c0_i32 = arith.constant 0 : i32
    %c0_i32_0 = arith.constant 0 : i32
    return %arg0, %c0_i32, %arg1 : i32, i32, i32
  }
  func.func @transform_1(%arg0: i32, %arg1: i32) -> (i32, i32) {
    %c0_i32 = arith.constant 0 : i32
    %c0_i32_0 = arith.constant 0 : i32
    %c0_i32_1 = arith.constant 0 : i32
    return %c0_i32, %c0_i32_0 : i32, i32
  }
  func.func @transform_2(%arg0: i32, %arg1: i32) -> (i32, i32) {
    %c0_i32 = arith.constant 0 : i32
    %c0_i32_0 = arith.constant 0 : i32
    %c0_i32_1 = arith.constant 0 : i32
    return %c0_i32, %c0_i32_0 : i32, i32
  }
  func.func @transform_3(%arg0: i32, %arg1: i32) -> (i32, i32) {
    %c0_i32 = arith.constant 0 : i32
    %c0_i32_0 = arith.constant 0 : i32
    %c0_i32_1 = arith.constant 0 : i32
    return %c0_i32, %c0_i32_0 : i32, i32
  }
  func.func @transform_4(%arg0: i32, %arg1: i32) -> (i32, i32) {
    %c0_i32 = arith.constant 0 : i32
    %c0_i32_0 = arith.constant 0 : i32
    %c0_i32_1 = arith.constant 0 : i32
    return %c0_i32, %c0_i32_0 : i32, i32
  }
  func.func @transform_5(%arg0: i32, %arg1: i32) -> (i32, i32) {
    %c0_i32 = arith.constant 0 : i32
    %c0_i32_0 = arith.constant 0 : i32
    %c0_i32_1 = arith.constant 0 : i32
    return %c0_i32, %c0_i32_0 : i32, i32
  }
  func.func @transform_6(%arg0: i32, %arg1: i32) -> (i32, i32) {
    %c0_i32 = arith.constant 0 : i32
    %c0_i32_0 = arith.constant 0 : i32
    %c0_i32_1 = arith.constant 0 : i32
    return %c0_i32, %c0_i32_0 : i32, i32
  }
  func.func @transform_7(%arg0: i32, %arg1: i32) -> (i32, i32) {
    %c0_i32 = arith.constant 0 : i32
    %c0_i32_0 = arith.constant 0 : i32
    %c0_i32_1 = arith.constant 0 : i32
    return %c0_i32, %c0_i32_0 : i32, i32
  }
  func.func @transform_8(%arg0: i32, %arg1: i32) -> (i32, i32, i32) {
    %c0_i32 = arith.constant 0 : i32
    %c0_i32_0 = arith.constant 0 : i32
    return %arg0, %c0_i32, %arg1 : i32, i32, i32
  }
  func.func @transform_9(%arg0: i32, %arg1: i32) -> (i32, i32, i32) {
    %c0_i32 = arith.constant 0 : i32
    %c0_i32_0 = arith.constant 0 : i32
    return %arg0, %c0_i32, %arg1 : i32, i32, i32
  }
}

</mosaic_0001>

<bundles_post_ra>
// kernel: ppnet_forward.1
= control target key start
LH: loop header
LB: loop body
LE: loop exit
PB: predicated region body
PF: predicated region fallthrough
CT: control target
= control target key end

     0   :  { %s1384_s30 = smov 0   ;;  %s1386_s10 = smov 0   ;;  %s1584_s0 = inlined_call_operand.vmem [shape: bf16[2,32,256], index: 0, kind: input, shape index: {}]   ;;  %s1585_s1 = inlined_call_operand.vmem [shape: bf16[32,32], index: 1, kind: input, shape index: {}]   ;;  %s1586_s2 = inlined_call_operand.vmem [shape: f32[32,1], index: 2, kind: input, shape index: {}]   ;;  %s1587_s3 = inlined_call_operand.vmem [shape: bf16[32,32], index: 3, kind: input, shape index: {}]   ;;  %s1588_s4 = inlined_call_operand.vmem [shape: f32[32,1], index: 4, kind: input, shape index: {}]   ;;  %s1589_s5 = inlined_call_operand.vmem [shape: bf16[40,32], index: 5, kind: input, shape index: {}]   ;;  %s1590_s6 = inlined_call_operand.vmem [shape: f32[40,1], index: 6, kind: input, shape index: {}]   ;;  %s1591_s7 = inlined_call_operand.vmem [shape: bf16[8,40], index: 7, kind: input, shape index: {}]   ;;  %s1592_s8 = inlined_call_operand.vmem [shape: f32[2,8,256], index: 8, kind: output, shape index: {0}]   ;;  %s1593_s9 = inlined_call_operand.vmem [shape: f32[2,40,256], index: 9, kind: output, shape index: {1}]  }
   0x1   :  { %s1388_s11 = smov 0  }
   0x2 LB: > { %s32_s12 = sadd.s32 1, %s1327_s10  ;;  %p1178_p0 = scmp.ge.s32.totalorder %s1331_s11, 1  ;;  %s1331_s11 = sphi %s1388_s11, %s20_s11   ;;  %s1327_s10 = sphi %s1386_s10, %s1603_s10   ;;  %s1323_s30 = sphi %s1384_s30, %s1602_s30  }
   0x3   : > { %p34_p1 = scmp.ge.s32.totalorder %s32_s12, 2  ;;  %p313_p2 = scmp.lt.s32.totalorder %s1331_s11, 3 }
   0x5   : > { %s1605_s12 = smov (%p34_p1, %s32_s12), 0  ;;  %p314_p3 = pnand %p1178_p0, %p313_p2 }
   0x6   : > { %p367_p4 = scmp.lt.s32.totalorder (!%p314_p3), %s1323_s30, 1  ;;  %v1333_v0 = vmov (!%p314_p3), 0   ;;  %v405_v1 = vld [vmem:[%s1586_s2] sm:$0xff] (!%p314_p3)  ;;  %v407_v2 = vld [vmem:[%s1586_s2 + $0x10] sm:$0xff] (!%p314_p3)  ;;  %v406_v3 = vld [vmem:[%s1586_s2 + $0x8] sm:$0xff] (!%p314_p3)  ;;  %vm459_vm0 = vcmask (!%p314_p3), 261120  }
   0x7   : > { %317 = sbr.rel (%p314_p3) target bundleno = 991 (0x3df), region = 52  ;;  %498 = vmatprep.mubr.bf16.mxu0 (!%p314_p3), %v1333_v0  ;;  %508 = vmatprep.mubr.bf16.mxu1 (!%p314_p3), %v1333_v0  ;;  %v535_v7 = vld [vmem:[%s1588_s4] sm:$0xff] (!%p314_p3)  ;;  %v408_v8 = vld [vmem:[%s1586_s2 + $0x18] sm:$0xff] (!%p314_p3)  ;;  %v1247_v11 = vld [vmem:[%s1585_s1 + $0x8] sm:$0xff] (!%p314_p3)   ;;  %vm987_vm10 = vcmask (!%p314_p3), 1043456   ;;  %vm983_vm12 = vcmask (!%p314_p3), 326656  }
   0x8   : > { %1238 = vset.pattern.permute.xlu0 (!%p314_p3), %v1333_v0  ;;  %1239 = vset.pattern.permute.xlu1 (!%p314_p3), %v1333_v0  ;;  %v1246_v10 = vld [vmem:[%s1585_s1] sm:$0xff] (!%p314_p3)   ;;  %v537_v12 = vld [vmem:[%s1588_s4 + $0x10] sm:$0xff] (!%p314_p3)  ;;  %v536_v13 = vld [vmem:[%s1588_s4 + $0x8] sm:$0xff] (!%p314_p3) }
   0x9   : > { %411 = vperm.xlu0 (!%p314_p3), %1238, %v405_v1   ;;  %421 = vperm.xlu1 (!%p314_p3), %1239, %v407_v2   ;;  %v796_v14 = vld [vmem:[%s1590_s6] sm:$0xff] (!%p314_p3)  ;;  %v538_v15 = vld [vmem:[%s1588_s4 + $0x18] sm:$0xff] (!%p314_p3)  ;;  %v798_v16 = vld [vmem:[%s1590_s6 + $0x10] sm:$0xff] (!%p314_p3) }
   0xa   : > { %v797_v17 = vld [vmem:[%s1590_s6 + $0x8] sm:$0xff] (!%p314_p3)  ;;  %v800_v18 = vld [vmem:[%s1590_s6 + $0x20] sm:$0xff] (!%p314_p3)  ;;  %v799_v19 = vld [vmem:[%s1590_s6 + $0x18] sm:$0xff] (!%p314_p3) }
   0xb   : > { %v1248_v52 = vld [vmem:[%s1587_s3] sm:$0xff] (!%p314_p3)   ;;  %v1249_v53 = vld [vmem:[%s1587_s3 + $0x8] sm:$0xff] (!%p314_p3)  }
   0xd   : > { %416 = vperm.xlu0 (!%p314_p3), %1238, %v406_v3   ;;  %426 = vperm.xlu1 (!%p314_p3), %1239, %v408_v8  }
   0xe   : > { %s1607_s30 = smov (!%p367_p4, %s1323_s30), 1 }
   0xf   : > { %s1206_s17 = sshll.u32 %s1607_s30, 5  ;;  %s1212_s23 = smul.u32 80, %s1607_s30 }
  0x10   : > { %s374_s22 = scalar_lea.vmem %s1584_s0, %s1206_s17  ;;  %s1207_s29 = sshll.u32 %s1607_s30, 4 }
  0x11   : > { %v1240_v4 = vld [vmem:[%s374_s22 + $0x4] ss:$8 sps:$4 sm:$0xff]   ;;  %v1242_v5 = vld [vmem:[%s374_s22] ss:$8 sps:$4 sm:$0xff]   ;;  %v1243_v6 = vld [vmem:[%s374_s22 + $0x14] ss:$8 sps:$4 sm:$0xff]   ;;  %541 = vperm.xlu0 %1238, %v535_v7   ;;  %546 = vperm.xlu1 %1239, %v536_v13   ;;  %s1492_s26 = scalar_lea.vmem %s1593_s9, %s1212_s23  ;;  %s384_s15 = scalar_lea.vmem %s1592_s8, %s1207_s29 }
  0x12   : > { %466 = vmatprep.subr.bf16.mxu0 %v1240_v4  ;;  %1208 = vmatprep.subr.bf16.mxu1 %v1240_v4  ;;  %v1245_v9 = vld [vmem:[%s374_s22 + $0x10] ss:$8 sps:$4 sm:$0xff]  }
  0x13   : > { %467 = vmatpush1.bf16.msra.mxu0 %v1242_v5  ;;  %1210 = vmatpush1.bf16.msra.mxu1 %v1242_v5 }
  0x14   : > { %468 = vmatprep.subr.bf16.mxu0 %v1243_v6  ;;  %1209 = vmatprep.subr.bf16.mxu1 %v1243_v6 }
  0x15   : > { %551 = vperm.xlu0 %1238, %v537_v12   ;;  %556 = vperm.xlu1 %1239, %v538_v15  }
  0x17   : > { %469 = vmatpush1.bf16.msra.mxu0 %v1245_v9  ;;  %1211 = vmatpush1.bf16.msra.mxu1 %v1245_v9 }
  0x19   : > { %803 = vperm.xlu0 %1238, %v796_v14   ;;  %808 = vperm.xlu1 %1239, %v797_v17  }
  0x1a   : > { %1190 = vmatmul.mubr.msk.bf16.vlgmr.msra.gmra.mrb[0].mxu0 %vm459_vm0, %v1246_v10  ;;  %1191 = vmatmul.mubr.msk.bf16.vlgmr.msra.gmra.mrb[0].mxu1 %vm459_vm0, %v1247_v11 }
  0x1b   : > { %607 = vmatprep.mubr.bf16.mxu1 %v1333_v0  ;;  %757 = vmatprep.mubr.bf16.mxu0 %v1333_v0 }
  0x1d   : > { %813 = vperm.xlu0 %1238, %v798_v16   ;;  %818 = vperm.xlu1 %1239, %v799_v19  }
  0x21   : > { %823 = vperm.xlu0 %1238, %v800_v18  }
  0x88   : > { %v412_v20 = vpop.permute.xlu0 %411  ;;  %v422_v21 = vpop.permute.xlu1 %421 }
  0x8c   : > { %v417_v22 = vpop.permute.xlu0 %416  ;;  %v427_v23 = vpop.permute.xlu1 %426 }
  0x90   : > { %v542_v54 = vpop.permute.xlu0 %541  ;;  %v547_v58 = vpop.permute.xlu1 %546 }
  0x94   : > { %v552_v5 = vpop.permute.xlu0 %551  ;;  %v557_v9 = vpop.permute.xlu1 %556 }
  0xed   : > { %v500_v24 = vpop.f32.mrb[0].mxu0  ;;  %v510_v25 = vpop.f32.mrb[0].mxu1 }
  0xee   : > { %v501_v26 = vadd.f32 %v500_v24, %v412_v20  ;;  %v511_v27 = vadd.f32 %v510_v25, %v422_v21  ;;  %v502_v28 = vpop.f32.mrb[1].mxu0  ;;  %v512_v29 = vpop.f32.mrb[1].mxu1 }
  0xef   : > { %v503_v30 = vadd.f32 %v502_v28, %v412_v20  ;;  %v513_v31 = vadd.f32 %v512_v29, %v422_v21  ;;  %v504_v32 = vpop.f32.mrb[2].mxu0  ;;  %v514_v33 = vpop.f32.mrb[2].mxu1 }
  0xf0   : > { %v523_v34 = vmax.f32 %v511_v27, 0.0  ;;  %v505_v35 = vadd.f32 %v504_v32, %v417_v22  ;;  %v515_v36 = vadd.f32 %v514_v33, %v427_v23  ;;  %v506_v37 = vpop.f32.mrb[3].mxu0  ;;  %v516_v38 = vpop.f32.mrb[3].mxu1  ;;  %v519_v42 = vmax.f32 %v501_v26, 0.0 }
  0xf1   : > { %v524_v39 = vmax.f32 %v513_v31, 0.0  ;;  %v507_v40 = vadd.f32 %v506_v37, %v417_v22  ;;  %v517_v41 = vadd.f32 %v516_v38, %v427_v23  ;;  %v520_v45 = vmax.f32 %v503_v30, 0.0 }
  0xf2   : > { %v521_v43 = vmax.f32 %v505_v35, 0.0  ;;  %v525_v44 = vmax.f32 %v515_v36, 0.0 }
  0xf3   : > { %v522_v46 = vmax.f32 %v507_v40, 0.0  ;;  %v526_v47 = vmax.f32 %v517_v41, 0.0 }
  0xf4   : > { %v527_v48 = vpack.c.bf16 %v521_v43, %v519_v42  ;;  %v529_v49 = vpack.c.bf16 %v525_v44, %v523_v34 }
  0xf5   : > { %v528_v50 = vpack.c.bf16 %v522_v46, %v520_v45  ;;  %v530_v51 = vpack.c.bf16 %v526_v47, %v524_v39 }
  0xf7   : > { %575 = vmatprep.subr.bf16.mxu1 %v528_v50 }
  0xf8   : > { %576 = vmatpush1.bf16.msra.mxu1 %v527_v48 }
  0xf9   : > { %577 = vmatprep.subr.bf16.mxu1 %v530_v51 }
  0xfc   : > { %578 = vmatpush1.bf16.msra.mxu1 %v529_v49 }
  0xff   : > { %1194 = vmatmul.mubr.msk.bf16.vlgmr.msra.gmra.mrb[4].mxu1 %vm459_vm0, %v1248_v52 }
 0x100   : > { %617 = vmatprep.mubr.bf16.mxu1 %v1333_v0 }
 0x107   : > { %1195 = vmatmul.mubr.msk.bf16.gmra.mrb[8].mxu1 %vm459_vm0, %v1249_v53 }
 0x108   : > { %1026 = vmatprep.mubr.bf16.mxu1 %v1333_v0 }
 0x1d2   : > { %v609_v55 = vpop.f32.mrb[4].mxu1 }
 0x1d3   : > { %v610_v56 = vadd.f32 %v609_v55, %v542_v54  ;;  %v611_v57 = vpop.f32.mrb[5].mxu1 }
 0x1d4   : > { %v612_v59 = vadd.f32 %v611_v57, %v542_v54  ;;  %v613_v60 = vpop.f32.mrb[6].mxu1 }
 0x1d5   : > { %v628_v61 = vmul.f32 0.5, %v610_v56  ;;  %v614_v62 = vadd.f32 %v613_v60, %v547_v58  ;;  %v615_v63 = vpop.f32.mrb[7].mxu1 }
 0x1d6   : > { %v629_v1 = vmul.f32 0.5, %v612_v59  ;;  %v616_v2 = vadd.f32 %v615_v63, %v547_v58  ;;  %v1250_v59 = vld [vmem:[%s1589_s5] sm:$0xff]  }
 0x1d7   : > { %1253 = vtanh.f32 %v628_v61  ;;  %v630_v3 = vmul.f32 0.5, %v614_v62 }
 0x1d8   : > { %1255 = vtanh.f32 %v629_v1  ;;  %v631_v4 = vmul.f32 0.5, %v616_v2 }
 0x1d9   : > { %1257 = vtanh.f32 %v630_v3 }
 0x1da   : > { %1259 = vtanh.f32 %v631_v4  ;;  %v619_v6 = vpop.f32.mrb[8].mxu1 }
 0x1db   : > { %v620_v7 = vadd.f32 %v619_v6, %v552_v5  ;;  %v621_v8 = vpop.f32.mrb[9].mxu1 }
 0x1dc   : > { %v622_v10 = vadd.f32 %v621_v8, %v552_v5  ;;  %v623_v11 = vpop.f32.mrb[10].mxu1  ;;  %v1252_v8 = vld [vmem:[%s1589_s5 + $0x10] ss:$0 sps:$4 sm:$0xff]  }
 0x1dd   : > { %v632_v12 = vmul.f32 0.5, %v620_v7  ;;  %v624_v13 = vadd.f32 %v623_v11, %v557_v9  ;;  %v625_v14 = vpop.f32.mrb[11].mxu1  ;;  %v1251_v7 = vld [vmem:[%s1589_s5 + $0x8] sm:$0xff]  }
 0x1de   : > { %v633_v15 = vmul.f32 0.5, %v622_v10  ;;  %v626_v16 = vadd.f32 %v625_v14, %v557_v9 }
 0x1df   : > { %1261 = vtanh.f32 %v632_v12  ;;  %v634_v17 = vmul.f32 0.5, %v624_v13 }
 0x1e0   : > { %1263 = vtanh.f32 %v633_v15  ;;  %v635_v18 = vmul.f32 0.5, %v626_v16 }
 0x1e1   : > { %v1254_v19 = vpop.eup %1253  ;;  %1265 = vtanh.f32 %v634_v17 }
 0x1e2   : > { %v1256_v20 = vpop.eup %1255  ;;  %v644_v21 = vmul.f32 0.5, %v1254_v19  ;;  %1267 = vtanh.f32 %v635_v18 }
 0x1e3   : > { %v1258_v22 = vpop.eup %1257  ;;  %v645_v23 = vmul.f32 0.5, %v1256_v20 }
 0x1e4   : > { %v1260_v24 = vpop.eup %1259  ;;  %v646_v25 = vmul.f32 0.5, %v1258_v22  ;;  %v652_v27 = vadd.f32 0.5, %v644_v21 }
 0x1e5   : > { %v647_v26 = vmul.f32 0.5, %v1260_v24  ;;  %v653_v29 = vadd.f32 0.5, %v645_v23  ;;  %v804_v23 = vpop.permute.xlu0 %803 }
 0x1e6   : > { %v654_v28 = vadd.f32 0.5, %v646_v25 }
 0x1e7   : > { %v655_v30 = vadd.f32 0.5, %v647_v26 }
 0x1e8   : > { %v660_v31 = vpack.c.bf16 %v654_v28, %v652_v27 }
 0x1e9   : > { %v1262_v32 = vpop.eup %1261  ;;  %v661_v33 = vpack.c.bf16 %v655_v30, %v653_v29  ;;  %v809_v29 = vpop.permute.xlu1 %808 }
 0x1ea   : > { %v1264_v34 = vpop.eup %1263  ;;  %v648_v35 = vmul.f32 0.5, %v1262_v32  ;;  %v664_v39 = vunpack.c.l.bf16 %v660_v31  ;;  %v666_v40 = vunpack.c.h.bf16 %v660_v31 }
 0x1eb   : > { %v1266_v36 = vpop.eup %1265  ;;  %v649_v37 = vmul.f32 0.5, %v1264_v34  ;;  %725 = vmatprep.subr.bf16.mxu0 %v661_v33  ;;  %v665_v43 = vunpack.c.l.bf16 %v661_v33  ;;  %v667_v44 = vunpack.c.h.bf16 %v661_v33 }
 0x1ec   : > { %v1268_v38 = vpop.eup %1267  ;;  %v650_v41 = vmul.f32 0.5, %v1266_v36  ;;  %726 = vmatpush1.bf16.msra.mxu0 %v660_v31  ;;  %v656_v45 = vadd.f32 0.5, %v648_v35  ;;  %v672_v49 = vmul.f32 %v664_v39, %v664_v39  ;;  %v674_v50 = vmul.f32 %v666_v40, %v666_v40 }
 0x1ed   : > { %v651_v42 = vmul.f32 0.5, %v1268_v38  ;;  %v657_v47 = vadd.f32 0.5, %v649_v37  ;;  %v673_v52 = vmul.f32 %v665_v43, %v665_v43  ;;  %v675_v53 = vmul.f32 %v667_v44, %v667_v44  ;;  %v814_v44 = vpop.permute.xlu0 %813 }
 0x1ee   : > { %v658_v46 = vadd.f32 0.5, %v650_v41  ;;  %v680_v60 = vadd.f32 %v674_v50, %v672_v49 }
 0x1ef   : > { %v659_v48 = vadd.f32 0.5, %v651_v42  ;;  %v689_v62 = vadd.f32 %v675_v53, %v673_v52 }
 0x1f0   : > { %v662_v51 = vpack.c.bf16 %v658_v46, %v656_v45 }
 0x1f1   : > { %v663_v54 = vpack.c.bf16 %v659_v48, %v657_v47 }
 0x1f2   : > { %v668_v55 = vunpack.c.l.bf16 %v662_v51  ;;  %v670_v56 = vunpack.c.h.bf16 %v662_v51 }
 0x1f3   : > { %v669_v57 = vunpack.c.l.bf16 %v663_v54  ;;  %v671_v58 = vunpack.c.h.bf16 %v663_v54  ;;  %727 = vmatprep.subr.bf16.mxu0 %v663_v54 }
 0x1f4   : > { %v676_v61 = vmul.f32 %v668_v55, %v668_v55  ;;  %728 = vmatpush1.bf16.msra.mxu0 %v662_v51  ;;  %v678_v1 = vmul.f32 %v670_v56, %v670_v56  ;;  %v819_v51 = vpop.permute.xlu1 %818 }
 0x1f5   : > { %v677_v63 = vmul.f32 %v669_v57, %v669_v57  ;;  %v679_v3 = vmul.f32 %v671_v58, %v671_v58 }
 0x1f6   : > { %v681_v2 = vadd.f32 %v680_v60, %v676_v61 }
 0x1f7   : > { %v690_v4 = vadd.f32 %v689_v62, %v677_v63  ;;  %1199 = vmatmul.mubr.msk.bf16.vlgmr.msra.gmra.mrb[4].mxu0 %vm459_vm0, %v1250_v59 }
 0x1f8   : > { %v682_v5 = vadd.f32 %v681_v2, %v678_v1  ;;  %767 = vmatprep.mubr.bf16.mxu0 %v1333_v0 }
 0x1f9   : > { %v691_v6 = vadd.f32 %v690_v4, %v679_v3  ;;  %v824_v3 = vpop.permute.xlu0 %823 }
 0x1fa   : > { %v683_v9 = vrot.slane %v682_v5, 4 }
 0x1fb   : > { %v692_v10 = vrot.slane %v691_v6, 4 }
 0x1fc   : > { %v684_v11 = vadd.f32 %v683_v9, %v682_v5 }
 0x1fd   : > { %v693_v12 = vadd.f32 %v692_v10, %v691_v6 }
 0x1fe   : > { %v685_v13 = vrot.slane %v684_v11, 2 }
 0x1ff   : > { %1200 = vmatmul.mubr.msk.bf16.gmra.mrb[8].mxu0 %vm459_vm0, %v1251_v7  ;;  %v694_v14 = vrot.slane %v693_v12, 2 }
 0x200   : > { %777 = vmatprep.mubr.bf16.mxu0 %v1333_v0  ;;  %v686_v15 = vadd.f32 %v685_v13, %v684_v11 }
 0x201   : > { %v695_v16 = vadd.f32 %v694_v14, %v693_v12 }
 0x202   : > { %v687_v17 = vrot.slane %v686_v15, 1 }
 0x203   : > { %v696_v18 = vrot.slane %v695_v16, 1 }
 0x204   : > { %v688_v19 = vadd.f32 %v687_v17, %v686_v15 }
 0x205   : > { %v1486_v0 = vadd.f32 %v696_v18, %v695_v16 }
 0x207   : > { %1201 = vmatmul.mubr.msk.bf16.gmra.mrb[12].mxu0 %vm459_vm0, %v1252_v8 }
 0x2ca   : > { %v759_v20 = vpop.f32.mrb[4].mxu0 }
 0x2cb   : > { %v786_v21 = vadd.f32 %v759_v20, %v688_v19  ;;  %v761_v22 = vpop.f32.mrb[5].mxu0 }
 0x2cc   : > { %v787_v24 = vadd.f32 %v761_v22, %v1486_v0  ;;  %v763_v25 = vpop.f32.mrb[6].mxu0 }
 0x2cd   : > { %v826_v26 = vadd.f32 %v804_v23, %v786_v21  ;;  %v788_v27 = vadd.f32 %v763_v25, %v688_v19  ;;  %v765_v28 = vpop.f32.mrb[7].mxu0 }
 0x2ce   : > { %v827_v30 = vadd.f32 %v804_v23, %v787_v24  ;;  %v789_v31 = vadd.f32 %v765_v28, %v1486_v0 }
 0x2cf   : > { %v836_v32 = vmax.f32 %v826_v26, 0.0  ;;  %v828_v33 = vadd.f32 %v809_v29, %v788_v27 }
 0x2d0   : > { %v837_v34 = vmax.f32 %v827_v30, 0.0  ;;  %v829_v35 = vadd.f32 %v809_v29, %v789_v31 }
 0x2d1   : > { %846 = vst [vmem:[%s1492_s26] sm:$0xff] %v836_v32  ;;  %v856_v36 = vadd.f32 0.0001, %v836_v32  ;;  %v838_v37 = vmax.f32 %v828_v33, 0.0 }
 0x2d2   : > { %847 = vst [vmem:[%s1492_s26 + $0x8] sm:$0xff] %v837_v34  ;;  %v857_v38 = vadd.f32 0.0001, %v837_v34  ;;  %v839_v39 = vmax.f32 %v829_v35, 0.0  ;;  %v769_v40 = vpop.f32.mrb[8].mxu0 }
 0x2d3   : > { %1269 = vrcp.f32 %v856_v36  ;;  %848 = vst [vmem:[%s1492_s26 + $0x10] sm:$0xff] %v838_v37  ;;  %v858_v41 = vadd.f32 0.0001, %v838_v37  ;;  %v790_v42 = vadd.f32 %v769_v40, %v688_v19  ;;  %v771_v43 = vpop.f32.mrb[9].mxu0 }
 0x2d4   : > { %1271 = vrcp.f32 %v857_v38  ;;  %849 = vst [vmem:[%s1492_s26 + $0x18] sm:$0xff] %v839_v39  ;;  %v859_v45 = vadd.f32 0.0001, %v839_v39  ;;  %v791_v46 = vadd.f32 %v771_v43, %v1486_v0  ;;  %v773_v47 = vpop.f32.mrb[10].mxu0 }
 0x2d5   : > { %1273 = vrcp.f32 %v858_v41  ;;  %v830_v48 = vadd.f32 %v814_v44, %v790_v42  ;;  %v792_v49 = vadd.f32 %v773_v47, %v688_v19  ;;  %v775_v50 = vpop.f32.mrb[11].mxu0 }
 0x2d6   : > { %1275 = vrcp.f32 %v859_v45  ;;  %v831_v52 = vadd.f32 %v814_v44, %v791_v46  ;;  %v793_v53 = vadd.f32 %v775_v50, %v1486_v0 }
 0x2d7   : > { %v840_v54 = vmax.f32 %v830_v48, 0.0  ;;  %v832_v55 = vadd.f32 %v819_v51, %v792_v49 }
 0x2d8   : > { %v841_v56 = vmax.f32 %v831_v52, 0.0  ;;  %v833_v57 = vadd.f32 %v819_v51, %v793_v53 }
 0x2d9   : > { %850 = vst [vmem:[%s1492_s26 + $0x20] sm:$0xff] %v840_v54  ;;  %v860_v58 = vadd.f32 0.0001, %v840_v54  ;;  %v842_v59 = vmax.f32 %v832_v55, 0.0 }
 0x2da   : > { %851 = vst [vmem:[%s1492_s26 + $0x28] sm:$0xff] %v841_v56  ;;  %v861_v60 = vadd.f32 0.0001, %v841_v56  ;;  %v843_v61 = vmax.f32 %v833_v57, 0.0  ;;  %v779_v62 = vpop.f32.mrb[12].mxu0 }
 0x2db   : > { %1277 = vrcp.f32 %v860_v58  ;;  %852 = vst [vmem:[%s1492_s26 + $0x30] sm:$0xff] %v842_v59  ;;  %v862_v63 = vadd.f32 0.0001, %v842_v59  ;;  %v794_v1 = vadd.f32 %v779_v62, %v688_v19  ;;  %v781_v2 = vpop.f32.mrb[13].mxu0 }
 0x2dc   : > { %1279 = vrcp.f32 %v861_v60  ;;  %853 = vst [vmem:[%s1492_s26 + $0x38] sm:$0xff] %v843_v61  ;;  %v863_v4 = vadd.f32 0.0001, %v843_v61  ;;  %v795_v5 = vadd.f32 %v781_v2, %v1486_v0  ;;  %v783_v6 = vpop.f32.mrb[14].mxu0 }
 0x2dd   : > { %v1270_v7 = vpop.eup %1269  ;;  %1281 = vrcp.f32 %v862_v63  ;;  %v834_v8 = vadd.f32 %v824_v3, %v794_v1  ;;  %v784_v9 = vpop.f32.mrb[15].mxu0 }
 0x2de   : > { %v1272_v10 = vpop.eup %1271  ;;  %v876_v11 = vmul.f32 0.9999, %v1270_v7  ;;  %1283 = vrcp.f32 %v863_v4  ;;  %v835_v12 = vadd.f32 %v824_v3, %v795_v5 }
 0x2df   : > { %v1274_v13 = vpop.eup %1273  ;;  %v877_v14 = vmul.f32 0.9999, %v1272_v10  ;;  %v844_v15 = vmax.f32 %v834_v8, 0.0 }
 0x2e0   : > { %v1276_v16 = vpop.eup %1275  ;;  %v845_v17 = vmax.f32 %v835_v12, 0.0  ;;  %v886_v18 = vadd.f32 1.0, %v876_v11  ;;  %v878_v21 = vmul.f32 0.9999, %v1274_v13  ;;  %v889_v25 = vmul.f32 -0.5, %v876_v11 }
 0x2e1   : > { %v879_v19 = vmul.f32 0.9999, %v1276_v16  ;;  %854 = vst [vmem:[%s1492_s26 + $0x40] sm:$0xff] %v844_v15  ;;  %v864_v20 = vadd.f32 0.0001, %v844_v15  ;;  %v895_v0 = vadd.f32 1.0, %v877_v14 }
 0x2e2   : > { %855 = vst [vmem:[%s1492_s26 + $0x48] sm:$0xff] %v845_v17  ;;  %v865_v22 = vadd.f32 0.0001, %v845_v17  ;;  %1285 = vlog2.f32 %v886_v18  ;;  %v898_v28 = vmul.f32 -0.5, %v877_v14  ;;  %v904_v29 = vadd.f32 1.0, %v878_v21 }
 0x2e3   : > { %1287 = vrcp.f32 %v864_v20  ;;  %v913_v23 = vadd.f32 1.0, %v879_v19  ;;  %v916_v33 = vmul.f32 -0.5, %v879_v19  ;;  %v901_v36 = vand.u32 2147483647, %v877_v14 }
 0x2e4   : > { %1289 = vrcp.f32 %v865_v22  ;;  %v890_v37 = vadd.f32 1.0, %v889_v25  ;;  %v899_v39 = vadd.f32 1.0, %v898_v28  ;;  %v919_v40 = vand.u32 2147483647, %v879_v19 }
 0x2e5   : > { %v1278_v24 = vpop.eup %1277  ;;  %1291 = vlog2.f32 %v895_v0  ;;  %v892_v41 = vand.u32 2147483647, %v876_v11  ;;  %v907_v42 = vmul.f32 -0.5, %v878_v21  ;;  %v910_v44 = vand.u32 2147483647, %v878_v21 }
 0x2e6   : > { %v1280_v26 = vpop.eup %1279  ;;  %v1508_v27 = vmul.f32 0.9999, %v1278_v24  ;;  %1293 = vlog2.f32 %v913_v23  ;;  %v917_v47 = vadd.f32 1.0, %v916_v33  ;;  %vm1519_vm1 = vcmp.lt.f32.partialorder %v901_v36, 0.0004427343 }
 0x2e7   : > { %v1282_v30 = vpop.eup %1281  ;;  %v1510_v31 = vmul.f32 0.9999, %v1280_v26  ;;  %1295 = vlog2.f32 %v904_v29  ;;  %v891_v50 = vmul.f32 %v890_v37, %v876_v11  ;;  %vm1523_vm2 = vcmp.lt.f32.partialorder %v919_v40, 0.0004427343 }
 0x2e8   : > { %v1284_v32 = vpop.eup %1283  ;;  %v922_v34 = vadd.f32 1.0, %v1508_v27  ;;  %v1516_v43 = vmul.f32 0.9999, %v1282_v30  ;;  %vm1527_vm3 = vcmp.lt.f32.partialorder %v892_v41, 0.0004427343  ;;  %v908_v54 = vadd.f32 1.0, %v907_v42 }
 0x2e9   : > { %v1513_v35 = vmul.f32 0.9999, %v1284_v32  ;;  %v931_v38 = vadd.f32 1.0, %v1510_v31  ;;  %v934_v55 = vmul.f32 -0.5, %v1510_v31  ;;  %v900_v58 = vmul.f32 %v899_v39, %v877_v14 }
 0x2ea   : > { %vm1534_vm4 = vcmp.lt.f32.partialorder %v910_v44, 0.0004427343  ;;  %v940_v60 = vadd.f32 1.0, %v1516_v43  ;;  %v918_v1 = vmul.f32 %v917_v47, %v879_v19  ;;  %v909_v7 = vmul.f32 %v908_v54, %v878_v21 }
 0x2eb   : > { %1297 = vlog2.f32 %v931_v38  ;;  %v949_v45 = vadd.f32 1.0, %v1513_v35  ;;  %v952_v2 = vmul.f32 -0.5, %v1513_v35  ;;  %v935_v8 = vadd.f32 1.0, %v934_v55 }
 0x2ec   : > { %v1286_v46 = vpop.eup %1285  ;;  %1299 = vlog2.f32 %v922_v34  ;;  %v937_v9 = vand.u32 2147483647, %v1510_v31  ;;  %v925_v10 = vmul.f32 -0.5, %v1508_v27  ;;  %v943_v16 = vmul.f32 -0.5, %v1516_v43 }
 0x2ed   : > { %v1288_v48 = vpop.eup %1287  ;;  %1301 = vlog2.f32 %v949_v45  ;;  %v888_v4 = vmul.f32 0.6931472, %v1286_v46  ;;  %v953_v15 = vadd.f32 1.0, %v952_v2  ;;  %v955_v0 = vand.u32 2147483647, %v1513_v35 }
 0x2ee   : > { %v1290_v51 = vpop.eup %1289  ;;  %v1539_v62 = vmul.f32 0.9999, %v1288_v48  ;;  %1303 = vlog2.f32 %v940_v60  ;;  %v936_v26 = vmul.f32 %v935_v8, %v1510_v31  ;;  %vm938_vm5 = vcmp.lt.f32.partialorder %v937_v9, 0.0004427343  ;;  %v976_v60 = vld [vmem:[%s1591_s7] sm:$0xf] }
 0x2ef   : > { %v1292_v56 = vpop.eup %1291  ;;  %v1532_v57 = vmul.f32 0.9999, %v1290_v51  ;;  %v894_v19 = vsel %vm1527_vm3, %v891_v50, %v888_v4  ;;  %v926_v28 = vadd.f32 1.0, %v925_v10  ;;  %v954_v30 = vmul.f32 %v953_v15, %v1513_v35 }
 0x2f0   : > { %v1294_v61 = vpop.eup %1293  ;;  %v897_v63 = vmul.f32 0.6931472, %v1292_v56  ;;  %v958_v17 = vadd.f32 1.0, %v1539_v62  ;;  %v928_v32 = vand.u32 2147483647, %v1508_v27  ;;  %v944_v33 = vadd.f32 1.0, %v943_v16 }
 0x2f1   : > { %v915_v3 = vmul.f32 0.6931472, %v1294_v61  ;;  %v967_v5 = vadd.f32 1.0, %v1532_v57  ;;  %v1296_v6 = vpop.eup %1295  ;;  %v970_v21 = vmul.f32 -0.5, %v1532_v57  ;;  %vm956_vm6 = vcmp.lt.f32.partialorder %v955_v0, 0.0004427343 }
 0x2f2   : > { %v903_v11 = vsel %vm1519_vm1, %v900_v58, %v897_v63  ;;  %v906_v13 = vmul.f32 0.6931472, %v1296_v6  ;;  %v946_v34 = vand.u32 2147483647, %v1516_v43  ;;  %v961_v37 = vmul.f32 -0.5, %v1539_v62 }
 0x2f3   : > { %v921_v12 = vsel %vm1523_vm2, %v918_v1, %v915_v3  ;;  %1305 = vlog2.f32 %v967_v5  ;;  %v971_v36 = vadd.f32 1.0, %v970_v21  ;;  %v973_v42 = vand.u32 2147483647, %v1532_v57 }
 0x2f4   : > { %v978_v14 = vpack.c.bf16 %v921_v12, %v903_v11  ;;  %v912_v20 = vsel %vm1534_vm4, %v909_v7, %v906_v13  ;;  %1307 = vlog2.f32 %v958_v17  ;;  %v927_v44 = vmul.f32 %v926_v28, %v1508_v27 }
 0x2f5   : > { %v1298_v18 = vpop.eup %1297  ;;  %v977_v23 = vpack.c.bf16 %v912_v20, %v894_v19  ;;  %v945_v35 = vmul.f32 %v944_v33, %v1516_v43  ;;  %vm929_vm7 = vcmp.lt.f32.partialorder %v928_v32, 0.0004427343  ;;  %vm947_vm8 = vcmp.lt.f32.partialorder %v946_v34, 0.0004427343 }
 0x2f6   : > { %v1300_v22 = vpop.eup %1299  ;;  %994 = vmatprep.subr.bf16.mxu1 %v978_v14  ;;  %v933_v24 = vmul.f32 0.6931472, %v1298_v18  ;;  %v972_v47 = vmul.f32 %v971_v36, %v1532_v57  ;;  %v962_v48 = vadd.f32 1.0, %v961_v37  ;;  %v964_v52 = vand.u32 2147483647, %v1539_v62 }
 0x2f7   : > { %v1302_v25 = vpop.eup %1301  ;;  %995 = vmatpush1.bf16.msra.mxu1 %v977_v23  ;;  %v924_v40 = vmul.f32 0.6931472, %v1300_v22  ;;  %vm974_vm9 = vcmp.lt.f32.partialorder %v973_v42, 0.0004427343 }
 0x2f8   : > { %v951_v29 = vmul.f32 0.6931472, %v1302_v25  ;;  %v939_v38 = vsel %vm938_vm5, %v936_v26, %v933_v24  ;;  %v1304_v41 = vpop.eup %1303  ;;  %v963_v56 = vmul.f32 %v962_v48, %v1539_v62  ;;  %vm965_vm11 = vcmp.lt.f32.partialorder %v964_v52, 0.0004427343 }
 0x2f9   : > { %v942_v45 = vmul.f32 0.6931472, %v1304_v41  ;;  %v930_v49 = vsel %vm929_vm7, %v927_v44, %v924_v40 }
 0x2fa   : > { %v957_v39 = vsel %vm956_vm6, %v954_v30, %v951_v29 }
 0x2fb   : > { %v980_v31 = vpack.c.bf16 %v957_v39, %v939_v38  ;;  %v948_v50 = vsel %vm947_vm8, %v945_v35, %v942_v45 }
 0x2fc   : > { %v979_v53 = vpack.c.bf16 %v948_v50, %v930_v49 }
 0x2fd   : > { %v1306_v46 = vpop.eup %1305  ;;  %996 = vmatprep.subr.bf16.mxu1 %v980_v31 }
 0x2fe   : > { %v969_v51 = vmul.f32 0.6931472, %v1306_v46  ;;  %v1308_v54 = vpop.eup %1307  ;;  %997 = vmatpush1.bf16.msra.mxu1 %v979_v53 }
 0x2ff   : > { %v960_v55 = vmul.f32 0.6931472, %v1308_v54 }
 0x300   : > { %v975_v27 = vsel %vm974_vm9, %v972_v47, %v969_v51 }
 0x301   : > { %v982_v43 = vpack.c.bf16 %v975_v27, %v975_v27  ;;  %v966_v57 = vsel %vm965_vm11, %v963_v56, %v960_v55 }
 0x302   : > { %v981_v58 = vpack.c.bf16 %v966_v57, %v966_v57 }
 0x303   : > { %1202 = vmatprep.subr.msk.bf16.mxu1 %vm987_vm10, %v982_v43 }
 0x304   : > { %v989_v59 = vsel %vm987_vm10, %v981_v58, 0 }
 0x305   : > { %999 = vmatpush1.bf16.msra.mxu1 %v989_v59 }
 0x308   : > { %1203 = vmatmul.mubr.msk.bf16.vlgmr.msra.gmra.mrb[12].mxu1 %vm983_vm12, %v976_v60 }
 0x3db   : > { %v1028_v61 = vpop.f32.mrb[12].mxu1 }
 0x3dc   : > { %1035 = vst [vmem:[%s384_s15] sm:$0xff] %v1028_v61  ;;  %v1030_v62 = vpop.f32.mrb[13].mxu1 }
 0x3dd   : > { %1036 = vst [vmem:[%s384_s15 + $0x8] sm:$0xff] %v1030_v62  ;;  %v1032_v63 = vpop.f32.mrb[14].mxu1 }
 0x3de   : > { %v1033_v1 = vpop.f32.mrb[15].mxu1 }
 0x3df PF: > { %s20_s11 = sadd.s32 1, %s1331_s11   ;;  %s1602_s30 = smov %s1327_s10 }
 0x3e0   : > { %p17_p5 = scmp.ge.s32.totalorder %s20_s11, 4   ;;  %s1603_s10 = smov %s1605_s12 }
 0x3e2   :  { %19 = sbr.rel (!%p17_p5) target bundleno = 2 (0x2), region = 94 }

</bundles_post_ra>
